<compile_context>
chip_gen: v7x
topology: tpu7x:2x2x1
jax: 0.10.0
libtpu: 0.0.40
codegen_flags: <defaults>
</compile_context>

<pallas_src>
import jax
import jax.numpy as jnp
from jax.experimental import pallas as pl
from jax.experimental.pallas import tpu as pltpu


def _sqdiag_kernel(w_ref, x_ref, b_ref, o_ref):
    # w_ref: (1, 1) f32 scalar in SMEM (scalar unit — free vs. the VPU work).
    # x_ref: (TB, C) input tile in VMEM.
    # b_ref: (1, C) bias row in VMEM, broadcast over the batch sublanes.
    # One vmul + one vadd per vreg; compute in f32, cast only the result.
    w = w_ref[0, 0]
    xf = x_ref[...].astype(jnp.float32)
    bf = b_ref[...].astype(jnp.float32)
    o_ref[...] = (xf * w + bf).astype(o_ref.dtype)


def square_diagonal_linear(x: jax.Array, weight: jax.Array, bias: jax.Array,
                           *, block_batch: int = 512) -> jax.Array:
    """x: [batch, in_features]; weight: scalar parameter (shape (1,)); bias: [in_features].

    Equivalent to torch: matmul(input, eye(in_features) * weight) + bias.
    """
    b, c = x.shape
    assert bias.shape == (c,)

    # Batch tile: full batch for small inputs (block == full array dim is always legal),
    # otherwise a multiple-of-8 tile in the 512 range.  VMEM budget (double-buffered
    # in + out, f32): 4 * TB * C * 4 bytes — TB=512 keeps this well under v7x's 64 MiB
    # for any reasonable class count.
    if b <= block_batch:
        tb = b
    else:
        tb = max(8, (block_batch // 8) * 8)
    grid = (pl.cdiv(b, tb),)

    # Keep the scalar weight in f32 regardless of x dtype (scalar math is free and
    # avoids extra rounding when x is bf16).
    w_smem = weight.reshape(1, 1).astype(jnp.float32)
    bias_row = bias.reshape(1, c)

    # NOTE: the last block dim is the full in_features, so stores are lane-dense as
    # long as in_features is a multiple of 128 (pad at the call site otherwise).
    return pl.pallas_call(
        _sqdiag_kernel,
        out_shape=jax.ShapeDtypeStruct((b, c), x.dtype),
        grid=grid,
        in_specs=[
            pl.BlockSpec((1, 1), lambda i: (0, 0), memory_space=pltpu.SMEM),
            pl.BlockSpec((tb, c), lambda i: (i, 0)),
            pl.BlockSpec((1, c), lambda i: (0, 0)),
        ],
        out_specs=pl.BlockSpec((tb, c), lambda i: (i, 0)),
        compiler_params=pltpu.CompilerParams(
            # Batch tiles are independent: lets v7x shard the grid across both
            # TensorCores; harmless on v5e/v6e.
            dimension_semantics=("parallel",),
        ),
    )(w_smem, x, bias_row)


if __name__ == "__main__":
    # Deterministic parameter init, mirroring
    #   weight = nn.Parameter(torch.randn(1)); bias = nn.Parameter(torch.zeros(in_features))
    in_features = 128
    batch = 16

    key = jax.random.PRNGKey(0)
    kw, kx, kb = jax.random.split(key, 3)
    weight = jax.random.normal(kw, (1,), dtype=jnp.float32)
    bias = jnp.zeros((in_features,), dtype=jnp.float32)
    x = jax.random.normal(kx, (batch, in_features), dtype=jnp.float32)

    # Forward pass with module-default (zero) bias.
    out = square_diagonal_linear(x, weight, bias)
    jax.block_until_ready(out)
    expected = x * weight[0] + bias[None, :]
    assert out.shape == x.shape and out.dtype == x.dtype
    assert jnp.allclose(out, expected, atol=1e-6, rtol=1e-6)

    # Also exercise the bias-broadcast path with a nonzero (deterministic) bias.
    bias2 = jax.random.normal(kb, (in_features,), dtype=jnp.float32)
    out2 = square_diagonal_linear(x, weight, bias2)
    jax.block_until_ready(out2)
    expected2 = x * weight[0] + bias2[None, :]
    assert jnp.allclose(out2, expected2, atol=1e-6, rtol=1e-6)

    print("KERNEL_OK")
</pallas_src>

<mosaic_0001>
module attributes {stable_mosaic.version = 11 : i64} {
  func.func @_sqdiag_kernel(%arg0: i32, %arg1: memref<1x1xf32, #tpu.memory_space<smem>>, %arg2: memref<16x128xf32, #tpu.memory_space<vmem>>, %arg3: memref<1x128xf32, #tpu.memory_space<vmem>>, %arg4: memref<16x128xf32, #tpu.memory_space<vmem>>) attributes {dimension_semantics = [#tpu.dimension_semantics<parallel>], iteration_bounds = array<i64: 1>, scalar_prefetch = 0 : i64, scratch_operands = 0 : i64, tpu.core_type = #tpu.core_type<tc>, window_params = [{transform_indices = @transform_0, window_bounds = array<i64: 1, 1>}, {transform_indices = @transform_1, window_bounds = array<i64: 16, 128>}, {pipeline_mode = #tpu.pipeline_mode<synchronous>, transform_indices = @transform_2, window_bounds = array<i64: 1, 128>}, {transform_indices = @transform_3, window_bounds = array<i64: 16, 128>}]} {
    %c0 = arith.constant 0 : index
    %c0_0 = arith.constant 0 : index
    %0 = memref.load %arg1[%c0, %c0_0] : memref<1x1xf32, #tpu.memory_space<smem>>
    %c0_1 = arith.constant 0 : index
    %c0_2 = arith.constant 0 : index
    %1 = vector.load %arg2[%c0_1, %c0_2] : memref<16x128xf32, #tpu.memory_space<vmem>>, vector<16x128xf32>
    %c0_3 = arith.constant 0 : index
    %c0_4 = arith.constant 0 : index
    %2 = vector.load %arg3[%c0_3, %c0_4] : memref<1x128xf32, #tpu.memory_space<vmem>>, vector<1x128xf32>
    %3 = vector.broadcast %0 : f32 to vector<16x128xf32>
    %4 = arith.mulf %1, %3 : vector<16x128xf32>
    %5 = vector.broadcast %2 : vector<1x128xf32> to vector<16x128xf32>
    %6 = arith.addf %4, %5 : vector<16x128xf32>
    %c0_5 = arith.constant 0 : index
    %c0_6 = arith.constant 0 : index
    %7 = vector.load %arg4[%c0_5, %c0_6] : memref<16x128xf32, #tpu.memory_space<vmem>>, vector<16x128xf32>
    tpu.vector_store %arg4[%c0_5, %c0_6], %6 {strides = array<i32>} : memref<16x128xf32, #tpu.memory_space<vmem>>, vector<16x128xf32>,
    return
  }
  func.func @transform_0(%arg0: i32) -> (i32, i32) {
    %c0_i32 = arith.constant 0 : i32
    %c0_i32_0 = arith.constant 0 : i32
    %c0_i32_1 = arith.constant 0 : i32
    return %c0_i32, %c0_i32_0 : i32, i32
  }
  func.func @transform_1(%arg0: i32) -> (i32, i32) {
    %c0_i32 = arith.constant 0 : i32
    %c0_i32_0 = arith.constant 0 : i32
    return %arg0, %c0_i32 : i32, i32
  }
  func.func @transform_2(%arg0: i32) -> (i32, i32) {
    %c0_i32 = arith.constant 0 : i32
    %c0_i32_0 = arith.constant 0 : i32
    %c0_i32_1 = arith.constant 0 : i32
    return %c0_i32, %c0_i32_0 : i32, i32
  }
  func.func @transform_3(%arg0: i32) -> (i32, i32) {
    %c0_i32 = arith.constant 0 : i32
    %c0_i32_0 = arith.constant 0 : i32
    return %arg0, %c0_i32 : i32, i32
  }
}

</mosaic_0001>

<bundles_post_ra>
// kernel: tpu_custom_call.1
= control target key start
LH: loop header
LB: loop body
LE: loop exit
PB: predicated region body
PF: predicated region fallthrough
CT: control target
= control target key end

     0   :  { %9 = vsyncpa [#allocation4], 0  ;;  %s177_s0 = inlined_call_operand.<no memory space> [shape: f32[1,1], index: 0, kind: input, shape index: {}]   ;;  %s178_s1 = inlined_call_operand.hbm [shape: f32[16,128], index: 1, kind: input, shape index: {}]   ;;  %s179_s2 = inlined_call_operand.vmem [shape: f32[1,128], index: 2, kind: input, shape index: {}]   ;;  %s180_s3 = inlined_call_operand.hbm [shape: f32[16,128], index: 3, kind: output, shape index: {}]  }
   0x1   :  { %10 = vsyncpa [#allocation5], 0  ;;  %s117_s12 = smov [#allocation3]   ;;  %s69_s16 = scalar_lea.hbm %s178_s1, 256 }
   0x2   :  { %s18_s13 = sshll.u32 %s117_s12, 4  ;;  %p70_p0 = scmp.ne.s32.totalorder %s178_s1, %s69_s16  ;;  %s19_s13 = int_to_ptr.vmem [resolvable:$true] %s18_s13 }
   0x3   :  { %p73_p1 = scmp.lt.u32.totalorder %s69_s16, %s178_s1 }
   0x5   :  { %p75_p2 = pnand %p73_p1, %p70_p0 }
   0x7   :  { %78 = shalt.err (!%p75_p2)
}
   0x8   :  { %s79_s21 = scalar_lea.vmem %s19_s13, 256  ;;  %p84_p4 = scmp.lt.s32.totalorder %s19_s13, %s19_s13 }
   0x9   :  { %p80_p3 = scmp.ne.s32.totalorder %s19_s13, %s79_s21  ;;  %p85_p5 = scmp.lt.s32.totalorder %s79_s21, %s79_s21 }
   0xb   :  { %p86_p6 = por %p85_p5, %p84_p4 }
   0xd   :  { %p87_p7 = pnand %p86_p6, %p80_p3 }
   0xf   :  { %90 = shalt.err (!%p87_p7)
}
  0x10   :  { %s118_s22 = smov 128   ;;  %s119_s23 = smov 8  }
  0x11   :  { %24 = dma.hbm_to_vmem [thread:$0]  %s178_s1, 256, %s19_s13, [#allocation4], %s118_s22, %s118_s22, %s119_s23  }
  0x12   :  { %113 = dma.done.wait [#allocation4], 256  }
  0x13   :  { %114 = vsyncadd [#allocation4], 4294967040  ;;  %v34_v0 = vstv %s177_s0  ;;  %v31_v1 = vld [vmem:[#allocation3] sm:$0xff]  ;;  %v32_v3 = vld [vmem:[#allocation3 + $0x8] sm:$0xff]  ;;  %s120_s30 = smov [#allocation6]  }
  0x14   :  { %v64_v2 = vld [vmem:[%s179_s2] ss:$0 sm:$0xff]  ;;  %s52_s4 = sshll.u32 %s120_s30, 4  ;;  %v35_v4 = vmul.f32 %v34_v0, %v31_v1  ;;  %v36_v5 = vmul.f32 %v34_v0, %v32_v3  ;;  %s53_s4 = int_to_ptr.vmem [resolvable:$true] %s52_s4 }
  0x15   :  { %s91_s1 = scalar_lea.vmem %s53_s4, 256  ;;  %p96_p9 = scmp.lt.s32.totalorder %s53_s4, %s53_s4 }
  0x16   :  { %v43_v6 = vadd.f32 %v64_v2, %v35_v4  ;;  %v44_v7 = vadd.f32 %v64_v2, %v36_v5  ;;  %p92_p8 = scmp.ne.s32.totalorder %s53_s4, %s91_s1  ;;  %p97_p10 = scmp.lt.s32.totalorder %s91_s1, %s91_s1 }
  0x18   :  { %45 = vst [vmem:[#allocation6] sm:$0xff] %v43_v6  ;;  %46 = vst [vmem:[#allocation6 + $0x8] sm:$0xff] %v44_v7  ;;  %p98_p11 = por %p97_p10, %p96_p9 }
  0x1a   :  { %p99_p12 = pnand %p98_p11, %p92_p8 }
  0x1c   :  { %102 = shalt.err (!%p99_p12)
}
  0x1d   :  { %s103_s2 = scalar_lea.hbm %s180_s3, 256 }
  0x1e   :  { %p104_p13 = scmp.ne.s32.totalorder %s180_s3, %s103_s2  ;;  %p107_p0 = scmp.lt.u32.totalorder %s103_s2, %s180_s3 }
  0x20   :  { %p109_p1 = pnand %p107_p0, %p104_p13 }
  0x22   :  { %112 = shalt.err (!%p109_p1)
}
  0x23   :  { %58 = dma.vmem_to_hbm [thread:$0]  %s53_s4, 256, %s180_s3, [#allocation5], %s118_s22, %s118_s22, %s119_s23  }
  0x24   :  { %115 = dma.done.wait [#allocation5], 256  }
  0x25   :  { %116 = vsyncadd [#allocation5], 4294967040 }
  0x26   :  { %62 = vsyncpa [#allocation4], 1 }
  0x27   :  { %63 = vsyncpa [#allocation5], 1 }

</bundles_post_ra>
